<compile_context>
chip_gen: v7x
topology: tpu7x:2x2x1
jax: 0.10.0
libtpu: 0.0.40
codegen_flags: <defaults>
</compile_context>

<pallas_src>
import functools

import jax
import jax.numpy as jnp
from jax import lax
from jax.experimental import pallas as pl
from jax.experimental.pallas import tpu as pltpu


def _round_up(v, m):
    return (v + m - 1) // m * m


# ----------------------------------------------------------------------------
# Pallas kernel 1: tiled matmul + bias (+ optional ReLU), bf16 MXU / f32 acc.
# Used for conv-as-im2col and the two Linear layers of the localization net.
# ----------------------------------------------------------------------------
def _matmul_bias_kernel(x_ref, w_ref, b_ref, o_ref, acc_ref, *, relu):
    @pl.when(pl.program_id(2) == 0)
    def _init():
        acc_ref[...] = jnp.zeros_like(acc_ref)

    acc_ref[...] += jnp.dot(x_ref[...], w_ref[...],
                            preferred_element_type=jnp.float32)

    @pl.when(pl.program_id(2) == pl.num_programs(2) - 1)
    def _store():
        out = acc_ref[...] + b_ref[...]
        if relu:
            out = jnp.maximum(out, 0.0)
        o_ref[...] = out.astype(o_ref.dtype)


def matmul_bias(x, w, b, relu=False):
    # x: (M, K), w: (K, N), b: (N,)  ->  (M, N) float32
    M, K = x.shape
    N = w.shape[1]

    # Tile sizes sized for v7x's smaller (64 MiB physical / 32 MiB scoped) VMEM.
    tm = min(256, _round_up(M, 8))
    kp128 = _round_up(K, 128)
    tk = kp128 if kp128 <= 512 else 512
    tn = min(256, _round_up(N, 128))
    Mp, Kp, Np = _round_up(M, tm), _round_up(K, tk), _round_up(N, tn)

    # Zero-pad to tile multiples (zero K columns contribute nothing; padded
    # M rows / N cols are sliced off).  bf16 feeds the MXU at native rate.
    xp = jnp.pad(x, ((0, Mp - M), (0, Kp - K))).astype(jnp.bfloat16)
    wp = jnp.pad(w, ((0, Kp - K), (0, Np - N))).astype(jnp.bfloat16)
    bp = jnp.pad(b.astype(jnp.float32), (0, Np - N)).reshape(1, Np)

    out = pl.pallas_call(
        functools.partial(_matmul_bias_kernel, relu=relu),
        out_shape=jax.ShapeDtypeStruct((Mp, Np), jnp.float32),
        grid=(Mp // tm, Np // tn, Kp // tk),
        in_specs=[
            pl.BlockSpec((tm, tk), lambda i, j, k: (i, k)),
            pl.BlockSpec((tk, tn), lambda i, j, k: (k, j)),
            pl.BlockSpec((1, tn), lambda i, j, k: (0, j)),
        ],
        out_specs=pl.BlockSpec((tm, tn), lambda i, j, k: (i, j)),
        scratch_shapes=[pltpu.VMEM((tm, tn), jnp.float32)],
        compiler_params=pltpu.CompilerParams(
            dimension_semantics=("parallel", "parallel", "arbitrary"),
            vmem_limit_bytes=32 * 1024 * 1024,
        ),
    )(xp, wp, bp)
    return out[:M, :N]


# ----------------------------------------------------------------------------
# Pallas kernel 2: TPS grid generation + bilinear grid_sample
# (align_corners=True, zero padding).  grid = (batch, pixel-tile).
# ----------------------------------------------------------------------------
def _warp_kernel(aff_ref, grid_ref, src_ref, kw_ref, img_ref, out_ref, *, H, W, C):
    b = pl.program_id(0)

    # Batch-invariant normalized meshgrid, precomputed outside, lane-dense.
    gx = grid_ref[0:1, :]                                   # (1, TP)
    gy = grid_ref[1:2, :]                                   # (1, TP)
    TP = gx.shape[1]

    # Affine part (scalars from SMEM):  out = a0 + gx*a1 + gy*a2.
    a00 = aff_ref[b, 0]
    a01 = aff_ref[b, 1]
    a10 = aff_ref[b, 2]
    a11 = aff_ref[b, 3]
    a20 = aff_ref[b, 4]
    a21 = aff_ref[b, 5]

    # Radial-basis part, vectorized over all N control points:
    # U (N, TP) then a single (2, N) x (N, TP) MXU matmul with the weights.
    srcx = src_ref[:, 0:1]                                  # (N, 1)
    srcy = src_ref[:, 1:2]                                  # (N, 1)
    dx = gx - srcx                                          # (N, TP)
    dy = gy - srcy                                          # (N, TP)
    r2 = dx * dx + dy * dy
    u = 0.5 * r2 * jnp.log(r2 + 1e-8)                       # (N, TP)
    rbf = jnp.dot(kw_ref[...], u, preferred_element_type=jnp.float32)  # (2, TP)

    wx = rbf[0:1, :] + a00 + gx * a10 + gy * a20            # (1, TP)
    wy = rbf[1:2, :] + a01 + gx * a11 + gy * a21            # (1, TP)

    # grid_sample: bilinear, align_corners=True, padding_mode='zeros'.
    px = (wx + 1.0) * (0.5 * (W - 1))
    py = (wy + 1.0) * (0.5 * (H - 1))
    x0 = jnp.floor(px)
    y0 = jnp.floor(py)
    fx = px - x0
    fy = py - y0

    # Transposed one-hot interpolation weights; out-of-range taps get weight 0.
    xi = lax.broadcasted_iota(jnp.float32, (W, TP), 0)
    yi = lax.broadcasted_iota(jnp.float32, (H, TP), 0)
    wx_t = (jnp.where(xi == x0, 1.0 - fx, 0.0) +
            jnp.where(xi == x0 + 1.0, fx, 0.0))             # (W, TP)
    wy_t = (jnp.where(yi == y0, 1.0 - fy, 0.0) +
            jnp.where(yi == y0 + 1.0, fy, 0.0))             # (H, TP)

    # One fused gather matmul across all channels: (C*H, W) x (W, TP).
    t = jnp.dot(img_ref[...], wx_t, preferred_element_type=jnp.float32)  # (C*H, TP)
    for c in range(C):
        out_ref[c:c + 1, :] = jnp.sum(t[c * H:(c + 1) * H, :] * wy_t,
                                      axis=0, keepdims=True)


def warp_image_tps(image, kernel_centers, kernel_weights, affine_weights):
    # image: (B, C, H, W); kernel_centers/kernel_weights: (B, N, 2); affine: (B, 3, 2)
    B, C, H, W = image.shape
    N = kernel_centers.shape[1]
    P = H * W
    TP = min(1024, _round_up(P, 128))
    P_pad = _round_up(P, TP)

    # Hoisted, batch-invariant normalized meshgrid (kornia-style linspace(-1,1)).
    gy_m, gx_m = jnp.meshgrid(jnp.linspace(-1.0, 1.0, H),
                              jnp.linspace(-1.0, 1.0, W), indexing="ij")
    grid_xy = jnp.stack([gx_m.reshape(-1), gy_m.reshape(-1)], axis=0)
    grid_xy = jnp.pad(grid_xy.astype(jnp.float32), ((0, 0), (0, P_pad - P)))

    src = kernel_centers.astype(jnp.float32)                       # (B, N, 2)
    kw_t = kernel_weights.transpose(0, 2, 1).astype(jnp.float32)   # (B, 2, N)
    aff = affine_weights.reshape(B, 6).astype(jnp.float32)         # (B, 6)
    img2d = image.astype(jnp.float32).reshape(B, C * H, W)         # (B, C*H, W)

    kernel = functools.partial(_warp_kernel, H=H, W=W, C=C)
    smem = pl.BlockSpec(memory_space=pltpu.MemorySpace.SMEM)
    out = pl.pallas_call(
        kernel,
        out_shape=jax.ShapeDtypeStruct((B, C, P_pad), jnp.float32),
        grid=(B, P_pad // TP),
        in_specs=[
            smem,                                                     # affine (B, 6)
            pl.BlockSpec((2, TP), lambda b, p: (0, p)),               # meshgrid
            pl.BlockSpec((None, N, 2), lambda b, p: (b, 0, 0)),       # src points
            pl.BlockSpec((None, 2, N), lambda b, p: (b, 0, 0)),       # kernel weights
            pl.BlockSpec((None, C * H, W), lambda b, p: (b, 0, 0)),   # image
        ],
        out_specs=pl.BlockSpec((None, C, TP), lambda b, p: (b, 0, p)),
        compiler_params=pltpu.CompilerParams(
            dimension_semantics=("parallel", "parallel"),
            vmem_limit_bytes=32 * 1024 * 1024,
        ),
    )(aff, grid_xy, src, kw_t, img2d)
    return out[:, :, :P].reshape(B, C, H, W)


# ----------------------------------------------------------------------------
# JAX glue: im2col (NHWC, no double transpose), pooling, fiducials, TPS solve.
# ----------------------------------------------------------------------------
def conv3x3_relu_nhwc(x, w, b):
    # x: (B, H, W, Cin), w: (Cout, Cin, 3, 3), b: (Cout,); padding=1, stride=1, ReLU
    B, H, W, Cin = x.shape
    Cout = w.shape[0]
    xp = jnp.pad(x, ((0, 0), (1, 1), (1, 1), (0, 0)))
    # TODO(synk): the im2col columns are still materialized in HBM; fusing the 9
    # (ky,kx) taps into the Pallas matmul K grid axis would remove this traffic.
    cols = jnp.concatenate(
        [xp[:, ky:ky + H, kx:kx + W, :] for ky in range(3) for kx in range(3)],
        axis=-1).reshape(B * H * W, 9 * Cin)
    wm = w.transpose(2, 3, 1, 0).reshape(9 * Cin, Cout)
    out = matmul_bias(cols, wm, b, relu=True)                  # Pallas
    return out.reshape(B, H, W, Cout)


def maxpool2_nhwc(x):
    B, H, W, C = x.shape
    return x.reshape(B, H // 2, 2, W // 2, 2, C).max(axis=(2, 4))


def adaptive_avg_pool_nhwc(x, fh, fw):
    B, H, W, C = x.shape
    assert H % fh == 0 and W % fw == 0
    return x.reshape(B, fh, H // fh, fw, W // fw, C).mean(axis=(2, 4))


def build_fiducial_points(num_fiducial):
    assert num_fiducial % 2 == 0
    half = num_fiducial // 2
    xs = jnp.linspace(-1.0, 1.0, half)
    top = jnp.stack([xs, jnp.full_like(xs, -1.0)], axis=1)
    bot = jnp.stack([xs, jnp.full_like(xs, +1.0)], axis=1)
    return jnp.concatenate([top, bot], axis=0).astype(jnp.float32)   # (F, 2)


def _pair_square_euclidean(a, b):
    diff = a[:, :, None, :] - b[:, None, :, :]
    return jnp.sum(diff * diff, axis=-1)


def _kernel_distance(d2, eps=1e-8):
    return 0.5 * d2 * jnp.log(d2 + eps)


def get_tps_transform(src, dst):
    # src, dst: (B, N, 2) -> kernel_weights (B, N, 2), affine_weights (B, 3, 2)
    B, N, _ = src.shape
    k = _kernel_distance(_pair_square_euclidean(src, src))          # (B, N, N)
    ones = jnp.ones((B, N, 1), jnp.float32)
    p = jnp.concatenate([ones, src], axis=-1)                       # (B, N, 3)
    zero33 = jnp.zeros((B, 3, 3), jnp.float32)
    l_top = jnp.concatenate([k, p], axis=-1)                        # (B, N, N+3)
    p_t = jnp.concatenate([p, zero33], axis=1).transpose(0, 2, 1)   # (B, 3, N+3)
    L = jnp.concatenate([l_top, p_t], axis=1)                       # (B, N+3, N+3)
    rhs = jnp.concatenate([dst, jnp.zeros((B, 3, 2), jnp.float32)], axis=1)
    # TODO(synk): small batched linear solve stays in plain JAX (no Pallas solve).
    w = jnp.linalg.solve(L, rhs)
    return w[:, :-3], w[:, -3:]


# ----------------------------------------------------------------------------
# Parameters (deterministic in-script init, mirroring the module's shapes).
# ----------------------------------------------------------------------------
def init_params(key, num_fiducial, H, W):
    feat_h, feat_w = H // 8, W // 8
    keys = jax.random.split(key, 4)

    def conv_init(k, cout, cin):
        bound = 1.0 / (cin * 9) ** 0.5
        kw, kb = jax.random.split(k)
        w = jax.random.uniform(kw, (cout, cin, 3, 3), jnp.float32, -bound, bound)
        b = jax.random.uniform(kb, (cout,), jnp.float32, -bound, bound)
        return w, b

    def linear_init(k, cout, cin):
        bound = 1.0 / cin ** 0.5
        kw, kb = jax.random.split(k)
        w = jax.random.uniform(kw, (cout, cin), jnp.float32, -bound, bound)
        b = jax.random.uniform(kb, (cout,), jnp.float32, -bound, bound)
        return w, b

    c1w, c1b = conv_init(keys[0], 32, 1)
    c2w, c2b = conv_init(keys[1], 64, 32)
    c3w, c3b = conv_init(keys[2], 128, 64)
    fc1w, fc1b = linear_init(keys[3], 256, 128 * feat_h * feat_w)
    ctrl = build_fiducial_points(num_fiducial)
    fc2w = jnp.zeros((num_fiducial * 2, 256), jnp.float32)   # zero-initialized, per module
    fc2b = ctrl.reshape(-1)                                  # bias = fiducial points
    return dict(c1w=c1w, c1b=c1b, c2w=c2w, c2b=c2b, c3w=c3w, c3b=c3b,
                fc1w=fc1w, fc1b=fc1b, fc2w=fc2w, fc2b=fc2b, ctrl=ctrl)


def tps_stn_forward(params, x, num_fiducial):
    B, C, H, W = x.shape
    feat_h, feat_w = H // 8, W // 8

    # localization network (NHWC internally; flatten in PyTorch's NCHW order)
    h = x.astype(jnp.float32).transpose(0, 2, 3, 1)
    h = conv3x3_relu_nhwc(h, params["c1w"], params["c1b"])
    h = maxpool2_nhwc(h)
    h = conv3x3_relu_nhwc(h, params["c2w"], params["c2b"])
    h = maxpool2_nhwc(h)
    h = conv3x3_relu_nhwc(h, params["c3w"], params["c3b"])
    h = maxpool2_nhwc(h)
    h = adaptive_avg_pool_nhwc(h, feat_h, feat_w)
    h = h.transpose(0, 3, 1, 2).reshape(B, -1)
    h = matmul_bias(h, params["fc1w"].T, params["fc1b"], relu=True)
    theta = matmul_bias(h, params["fc2w"].T, params["fc2b"], relu=False)

    delta = theta.reshape(B, num_fiducial, 2) * 0.1
    dst_pts = jnp.broadcast_to(params["ctrl"][None], (B, num_fiducial, 2))
    src_pts = dst_pts + delta

    kernel_w, affine_w = get_tps_transform(src_pts, dst_pts)
    return warp_image_tps(x, src_pts, kernel_w, affine_w)


if __name__ == "__main__":
    B, C, H, W = 2, 1, 16, 16          # module's conv stack expects 1 input channel
    num_fiducial = 8

    key = jax.random.PRNGKey(0)
    x = jax.random.normal(key, (B, C, H, W), jnp.float32)
    params = init_params(jax.random.PRNGKey(42), num_fiducial, H, W)

    out = tps_stn_forward(params, x, num_fiducial)
    out = jax.block_until_ready(out)
    assert out.shape == (B, C, H, W), out.shape
    assert bool(jnp.all(jnp.isfinite(out)))
    print("KERNEL_OK")
</pallas_src>

<mosaic_0001>
module attributes {stable_mosaic.version = 11 : i64} {
  func.func @_matmul_bias_kernel(%arg0: i32, %arg1: i32, %arg2: i32, %arg3: memref<256x128xbf16, #tpu.memory_space<vmem>>, %arg4: memref<128x128xbf16, #tpu.memory_space<vmem>>, %arg5: memref<1x128xf32, #tpu.memory_space<vmem>>, %arg6: memref<256x128xf32, #tpu.memory_space<vmem>>, %arg7: memref<256x128xf32, #tpu.memory_space<vmem>>) attributes {dimension_semantics = [#tpu.dimension_semantics<parallel>, #tpu.dimension_semantics<parallel>, #tpu.dimension_semantics<arbitrary>], iteration_bounds = array<i64: 2, 1, 1>, scalar_prefetch = 0 : i64, scratch_operands = 1 : i64, tpu.core_type = #tpu.core_type<tc>, window_params = [{transform_indices = @transform_0, window_bounds = array<i64: 256, 128>}, {transform_indices = @transform_1, window_bounds = array<i64: 128, 128>}, {transform_indices = @transform_2, window_bounds = array<i64: 1, 128>}, {transform_indices = @transform_3, window_bounds = array<i64: 256, 128>}]} {
    %c0_i32 = arith.constant 0 : i32
    %0 = arith.cmpi eq, %arg2, %c0_i32 : i32
    %1 = arith.extui %0 : i1 to i32
    %c0_i32_0 = arith.constant 0 : i32
    %2 = arith.cmpi ne, %1, %c0_i32_0 : i32
    scf.if %2 {
      %cst_10 = arith.constant 0.000000e+00 : f32
      %12 = vector.broadcast %cst_10 : f32 to vector<256x128xf32>
      %c0_11 = arith.constant 0 : index
      %c0_12 = arith.constant 0 : index
      %13 = vector.load %arg7[%c0_11, %c0_12] : memref<256x128xf32, #tpu.memory_space<vmem>>, vector<256x128xf32>
      tpu.vector_store %arg7[%c0_11, %c0_12], %12 {strides = array<i32>} : memref<256x128xf32, #tpu.memory_space<vmem>>, vector<256x128xf32>,
    } else {
    }
    %c0 = arith.constant 0 : index
    %c0_1 = arith.constant 0 : index
    %3 = vector.load %arg7[%c0, %c0_1] : memref<256x128xf32, #tpu.memory_space<vmem>>, vector<256x128xf32>
    %c0_2 = arith.constant 0 : index
    %c0_3 = arith.constant 0 : index
    %4 = vector.load %arg3[%c0_2, %c0_3] : memref<256x128xbf16, #tpu.memory_space<vmem>>, vector<256x128xbf16>
    %c0_4 = arith.constant 0 : index
    %c0_5 = arith.constant 0 : index
    %5 = vector.load %arg4[%c0_4, %c0_5] : memref<128x128xbf16, #tpu.memory_space<vmem>>, vector<128x128xbf16>
    %cst = arith.constant dense<0.000000e+00> : vector<256x128xf32>
    %6 = tpu.matmul %4, %5, %cst {dimension_numbers = #tpu.dot_dimension_numbers<[1], [0], [0], [1], [0, 0, 1, 1], [], []>} : vector<256x128xbf16>, vector<128x128xbf16>, vector<256x128xf32> -> vector<256x128xf32>
    %7 = arith.addf %3, %6 : vector<256x128xf32>
    %c0_6 = arith.constant 0 : index
    %c0_7 = arith.constant 0 : index
    %8 = vector.load %arg7[%c0_6, %c0_7] : memref<256x128xf32, #tpu.memory_space<vmem>>, vector<256x128xf32>
    tpu.vector_store %arg7[%c0_6, %c0_7], %7 {strides = array<i32>} : memref<256x128xf32, #tpu.memory_space<vmem>>, vector<256x128xf32>,
    %c0_i32_8 = arith.constant 0 : i32
    %9 = arith.cmpi eq, %arg2, %c0_i32_8 : i32
    %10 = arith.extui %9 : i1 to i32
    %c0_i32_9 = arith.constant 0 : i32
    %11 = arith.cmpi ne, %10, %c0_i32_9 : i32
    scf.if %11 {
      %c0_10 = arith.constant 0 : index
      %c0_11 = arith.constant 0 : index
      %12 = vector.load %arg7[%c0_10, %c0_11] : memref<256x128xf32, #tpu.memory_space<vmem>>, vector<256x128xf32>
      %c0_12 = arith.constant 0 : index
      %c0_13 = arith.constant 0 : index
      %13 = vector.load %arg5[%c0_12, %c0_13] : memref<1x128xf32, #tpu.memory_space<vmem>>, vector<1x128xf32>
      %14 = vector.broadcast %13 : vector<1x128xf32> to vector<256x128xf32>
      %15 = arith.addf %12, %14 : vector<256x128xf32>
      %cst_14 = arith.constant 0.000000e+00 : f32
      %16 = vector.broadcast %cst_14 : f32 to vector<256x128xf32>
      %17 = arith.maximumf %15, %16 : vector<256x128xf32>
      %c0_15 = arith.constant 0 : index
      %c0_16 = arith.constant 0 : index
      %18 = vector.load %arg6[%c0_15, %c0_16] : memref<256x128xf32, #tpu.memory_space<vmem>>, vector<256x128xf32>
      tpu.vector_store %arg6[%c0_15, %c0_16], %17 {strides = array<i32>} : memref<256x128xf32, #tpu.memory_space<vmem>>, vector<256x128xf32>,
    } else {
    }
    return
  }
  func.func @transform_0(%arg0: i32, %arg1: i32, %arg2: i32) -> (i32, i32) {
    %c0_i32 = arith.constant 0 : i32
    return %arg0, %arg2 : i32, i32
  }
  func.func @transform_1(%arg0: i32, %arg1: i32, %arg2: i32) -> (i32, i32) {
    %c0_i32 = arith.constant 0 : i32
    return %arg2, %arg1 : i32, i32
  }
  func.func @transform_2(%arg0: i32, %arg1: i32, %arg2: i32) -> (i32, i32) {
    %c0_i32 = arith.constant 0 : i32
    %c0_i32_0 = arith.constant 0 : i32
    return %c0_i32, %arg1 : i32, i32
  }
  func.func @transform_3(%arg0: i32, %arg1: i32, %arg2: i32) -> (i32, i32) {
    %c0_i32 = arith.constant 0 : i32
    return %arg0, %arg1 : i32, i32
  }
}

</mosaic_0001>

<bundles_post_ra>
// kernel: tpu_custom_call.1
= control target key start
LH: loop header
LB: loop body
LE: loop exit
PB: predicated region body
PF: predicated region fallthrough
CT: control target
= control target key end

     0   :  { %8 = vsyncpa [#allocation4], 0  ;;  %s1732_s0 = inlined_call_operand.hbm [shape: bf16[512,128], index: 0, kind: input, shape index: {}]   ;;  %s1733_s1 = inlined_call_operand.hbm [shape: bf16[128,128], index: 1, kind: input, shape index: {}]   ;;  %s1734_s2 = inlined_call_operand.vmem [shape: f32[1,128], index: 2, kind: input, shape index: {}]   ;;  %s1735_s3 = inlined_call_operand.hbm [shape: f32[512,128], index: 3, kind: output, shape index: {}]  }
   0x1   :  { %10 = vsyncpa [#allocation4 + $0x1], 0 }
   0x2   :  { %11 = vsyncpa [#allocation7], 0 }
   0x3   :  { %12 = vsyncpa [#allocation5], 0 }
   0x4   :  { %14 = vsyncpa [#allocation5 + $0x1], 0  ;;  %s1416_s12 = smov 0   ;;  %s1418_s13 = smov 0  }
   0x5   :  { %s1420_s14 = smov 0   ;;  %s1422_s15 = smov 0  }
   0x6   :  { %s1424_s16 = smov 0   ;;  %s1426_s17 = smov 0  }
   0x7 LB: > { %s1009_s18 = sadd.s32 4294967295, %s1387_s17   ;;  %s1010_s19 = sadd.s32 4294967294, %s1387_s17   ;;  %s1387_s17 = sphi %s1426_s17, %s20_s17   ;;  %s1383_s16 = sphi %s1424_s16, %s1759_s16   ;;  %s1379_s15 = sphi %s1422_s15, %s1758_s15   ;;  %s1375_s14 = sphi %s1420_s14, %s1757_s14   ;;  %s1371_s13 = sphi %s1418_s13, %s1756_s13   ;;  %s1367_s12 = sphi %s1416_s12, %s1755_s12  }
   0x8   : > { %p61_p0 = scmp.ne.s32.totalorder %s1371_s13, %s1367_s12  ;;  %p1450_p1 = scmp.eq.s32.totalorder %s1009_s18, 0 }
   0x9   : > { %p1454_p2 = scmp.eq.s32.totalorder %s1009_s18, 1  ;;  %p147_p3 = scmp.eq.s32.totalorder %s1010_s19, 1 }
   0xa   : > { %s1740_s20 = scalar_select %p1450_p1, 1, 0 }
   0xb   : > { %s1741_s21 = scalar_select %p1454_p2, 1, 0 }
   0xc   : > { %p1460_p4 = por %p1450_p1, %p61_p0  ;;  %p1011_p5 = scmp.ge.s32.totalorder %s1387_s17, 1 }
   0xd   : > { %p1465_p6 = por %p147_p3, %p61_p0  ;;  %p154_p7 = scmp.lt.s32.totalorder %s1387_s17, 3 }
   0xe   : > { %s1742_s22 = scalar_select %p1460_p4, 1, 0 }
   0xf   : > { %s1743_s23 = scalar_select %p1465_p6, 1, 0 }
  0x10   : > { %p1470_p8 = pnand %p1011_p5, %p154_p7  ;;  %s1389_s25 = smov [#allocation6]  }
  0x11   : > { %s170_s26 = sshll.u32 %s1389_s25, 4  ;;  %s39_s28 = sadd.s32 1, %s1383_s16  ;;  %s171_s26 = int_to_ptr.vmem [resolvable:$true] %s170_s26 }
  0x12   : > { %s1744_s24 = scalar_select %p1470_p8, 1, 0 }
  0x13   : > { %p1150_p9 = pneg %p1470_p8  ;;  %s1243_s4 = scalar_lea.hbm %s1733_s1, 1024 }
  0x14   : > { %p1244_p12 = scmp.ne.s32.totalorder %s1733_s1, %s1243_s4  ;;  %p1250_p5 = scmp.lt.u32.totalorder %s1243_s4, %s1733_s1 }
  0x15   : > { %p1479_p11 = pnand %p1150_p9, %p1450_p1 }
  0x17   : > { %p1245_p13 = pneg %p1479_p11 }
  0x19   : > { %p1246_p0 = pnand %p1245_p13, %p1244_p12 }
  0x1b   : > { %p1247_p3 = pneg %p1246_p0 }
  0x1d   : > { %p1252_p7 = pnand %p1250_p5, %p1247_p3 }
  0x1f   : > { %1255 = shalt.err (!%p1252_p7)
}
  0x20   : > { %s1256_s9 = scalar_lea.vmem %s171_s26, 1024  ;;  %p1264_p1 = scmp.lt.s32.totalorder %s171_s26, %s171_s26 }
  0x21   : > { %p1257_p9 = scmp.ne.s32.totalorder %s171_s26, %s1256_s9  ;;  %p1265_p4 = scmp.lt.s32.totalorder %s1256_s9, %s1256_s9 }
  0x23   : > { %p1259_p10 = pnand %p1257_p9, %p1245_p13  ;;  %p1266_p8 = por %p1265_p4, %p1264_p1 }
  0x25   : > { %p1260_p6 = pneg %p1259_p10 }
  0x27   : > { %p1267_p2 = pnand %p1266_p8, %p1260_p6 }
  0x29   : > { %1270 = shalt.err (!%p1267_p2)
}
  0x2a   : > { %s1390_s10 = smov 64   ;;  %s1391_s11 = smov 4  }
  0x2b   : > { %1153 = dma.hbm_to_vmem [thread:$0]  (!%p1479_p11), %s1733_s1, 1024, %s171_s26, [#allocation7], %s1390_s10, %s1390_s10, %s1391_s11  }
  0x2c   : > { %p41_p1 = scmp.ge.s32.totalorder %s39_s28, 2  ;;  %s48_s25 = sadd.s32 1, %s1375_s14 }
  0x2d   : > { %p55_p2 = scmp.ne.s32.totalorder %s1375_s14, %s1371_s13  ;;  %p56_p4 = scmp.eq.s32.totalorder %s1387_s17, 0 }
  0x2e   : > { %s1761_s28 = smov (%p41_p1, %s39_s28), 0  ;;  %p1747_p8 = scmp.ne.s32.totalorder %s1741_s21, 0 }
  0x2f   : > { %p1509_p6 = por %p56_p4, %p55_p2  ;;  %s43_s30 = ssub.s32 %s1383_s16, %s1761_s28 }
  0x30   : > { %p1515_p10 = por %p1747_p8, %p55_p2  ;;  %p1163_p12 = scmp.lt.s32.totalorder %s1387_s17, 2 }
  0x31   : > { %p46_p11 = scmp.eq.s32.totalorder %s43_s30, 0  ;;  %s190_s26 = sand.u32 1, %s1375_s14  }
  0x32   : > { %s1015_s4 = sshll.u32 %s190_s26, 7  ;;  %s1052_s6 = sshll.u32 %s1383_s16, 11 }
  0x33   : > { %s1524_s5 = scalar_select %p46_p11, %s1375_s14, %s48_s25  }
  0x34   : > { %s1530_s9 = scalar_lea.hbm %s1732_s0, %s1052_s6  ;;  %s194_s21 = scalar_lea.vmem [#allocation3], %s1015_s4 }
  0x35   : > { %s202_s18 = sshll.u32 %s194_s21, 4  ;;  %p1536_p13 = pnand %p1163_p12, %p1509_p6  ;;  %s1532_s18 = int_to_ptr.vmem [resolvable:$true] %s202_s18 }
  0x36   : > { %s1540_s25 = scalar_lea.sflag [#allocation4], %s190_s26  ;;  %s1271_s30 = scalar_lea.hbm %s1530_s9, 2048 }
  0x37   : > { %p1272_p0 = scmp.ne.s32.totalorder %s1530_s9, %s1271_s30  ;;  %p1273_p3 = pneg %p1536_p13 }
  0x38   : > { %s1276_s29 = scalar_lea.hbm %s1732_s0, 4096  ;;  %p1277_p9 = scmp.lt.u32.totalorder %s1530_s9, %s1732_s0 }
  0x39   : > { %p1274_p5 = pnand %p1273_p3, %p1272_p0  ;;  %p1278_p1 = scmp.lt.u32.totalorder %s1276_s29, %s1271_s30 }
  0x3a   : > { %p1280_p4 = scmp.lt.u32.totalorder %s1271_s30, %s1530_s9 }
  0x3b   : > { %p1275_p7 = pneg %p1274_p5  ;;  %p1279_p2 = por %p1278_p1, %p1277_p9 }
  0x3d   : > { %p1281_p6 = por %p1280_p4, %p1279_p2 }
  0x3f   : > { %p1282_p8 = pnand %p1281_p6, %p1275_p7 }
  0x41   : > { %1285 = shalt.err (!%p1282_p8)
}
  0x42   : > { %s1286_s26 = scalar_lea.vmem %s1532_s18, 2048  ;;  %s1392_s21 = smov [#allocation3]  }
  0x43   : > { %p1287_p12 = scmp.ne.s32.totalorder %s1532_s18, %s1286_s26  ;;  %s1291_s4 = sshll.u32 %s1392_s21, 4  ;;  %s1292_s4 = int_to_ptr.vmem [resolvable:$false] %s1291_s4 }
  0x44   : > { %s1293_s6 = scalar_lea.vmem %s1292_s4, 4096  ;;  %p1294_p5 = scmp.lt.s32.totalorder %s1532_s18, %s1292_s4 }
  0x45   : > { %p1289_p11 = pnand %p1287_p12, %p1273_p3  ;;  %p1295_p9 = scmp.lt.s32.totalorder %s1293_s6, %s1286_s26 }
  0x47   : > { %p1290_p0 = pneg %p1289_p11  ;;  %p1296_p1 = por %p1295_p9, %p1294_p5 }
  0x49   : > { %p1297_p2 = pnand %p1296_p1, %p1290_p0 }
  0x4b   : > { %1300 = shalt.err (!%p1297_p2)
}
  0x4c   : > { %1157 = dma.hbm_to_vmem [thread:$0]  (!%p1536_p13), %s1530_s9, 2048, %s1532_s18, %s1540_s25, %s1390_s10, %s1390_s10, %s1391_s11  }
  0x4d   : > { %p1750_p3 = scmp.ne.s32.totalorder %s1744_s24, 0 }
  0x4e   : > { %s1574_s30 = sand.u32 (!%p1750_p3), 1, %s1371_s13   ;;  %p1751_p7 = scmp.ne.s32.totalorder (!%p1750_p3), %s1742_s22, 0 }
  0x4f   : > { %214 = sbr.rel (%p1750_p3) target bundleno = 381 (0x17d), region = 32  ;;  %s1019_s29 = sshll.u32 (!%p1750_p3), %s1574_s30, 7 }
  0x50   : > { %s217_s7 = scalar_lea.sflag (!%p1750_p3), [#allocation4], %s1574_s30  ;;  %s1578_s8 = scalar_lea.vmem (!%p1750_p3), [#allocation3], %s1019_s29 }
  0x56   : > { %1354 = dma.done.wait (%p1751_p7), %s217_s7, 2048  }
  0x57   : > { %1356 = vsyncadd (%p1751_p7), %s217_s7, 4294965248  ;;  %p1752_p13 = scmp.ne.s32.totalorder %s1740_s20, 0 }
  0x59   : > { %1358 = dma.done.wait (%p1752_p13), [#allocation7], 1024  }
  0x5a   : > { %1360 = vsyncadd (%p1752_p13), [#allocation7], 4294966272  ;;  %v1219_v0 = vld [vmem:[#allocation6] sm:$0xff]   ;;  %v1220_v1 = vld [vmem:[#allocation6 + $0x8] sm:$0xff]   ;;  %s1021_s24 = sshll.u32 %s1574_s30, 8  ;;  %s1053_s11 = sshll.u32 %s1379_s15, 12 }
  0x5b   : > { %1078 = vmatprep.subr.bf16.mxu0 %v1219_v0  ;;  %1126 = vmatprep.subr.bf16.mxu1 %v1219_v0  ;;  %v1221_v2 = vld [vmem:[#allocation6 + $0x10] sm:$0xff]   ;;  %v1222_v3 = vld [vmem:[#allocation6 + $0x18] sm:$0xff]   ;;  %v1227_v4 = vld [vmem:[%s1578_s8] sm:$0xff]   ;;  %s1618_s10 = scalar_lea.vmem [#allocation8], %s1021_s24  ;;  %s1675_s19 = scalar_lea.hbm %s1735_s3, %s1053_s11 }
  0x5c   : > { %1079 = vmatpush3.bf16.msra.mxu0 %v1219_v0  ;;  %1134 = vmatpush3.bf16.msra.mxu1 %v1219_v0  ;;  %v1228_v5 = vld [vmem:[%s1578_s8 + $0x40] sm:$0xff]   ;;  %v1224_v7 = vld [vmem:[#allocation6 + $0x28] sm:$0xff]   ;;  %v1225_v8 = vld [vmem:[#allocation6 + $0x30] sm:$0xff]   ;;  %s895_s9 = sshll.u32 %s1618_s10, 4  ;;  %s881_s25 = scalar_lea.sflag [#allocation5], %s1574_s30  ;;  %s1677_s9 = int_to_ptr.vmem [resolvable:$true] %s895_s9 }
  0x5d   : > { %1080 = vmatprep.subr.bf16.mxu0 %v1220_v1  ;;  %1127 = vmatprep.subr.bf16.mxu1 %v1220_v1  ;;  %v1223_v6 = vld [vmem:[#allocation6 + $0x20] sm:$0xff]   ;;  %v1226_v9 = vld [vmem:[#allocation6 + $0x38] sm:$0xff]   ;;  %v1229_v10 = vld [vmem:[%s1578_s8 + $0x8] sm:$0xff]   ;;  %s1301_s26 = scalar_lea.vmem %s1677_s9, 4096  ;;  %s1393_s21 = smov [#allocation8]  }
  0x5e   : > { %1094 = vmatprep.mubr.bf16.mxu0 %v1227_v4  ;;  %1110 = vmatprep.mubr.bf16.mxu1 %v1228_v5  ;;  %v1230_v11 = vld [vmem:[%s1578_s8 + $0x48] sm:$0xff]   ;;  %v1231_v12 = vld [vmem:[%s1578_s8 + $0x10] sm:$0xff]   ;;  %v1233_v14 = vld [vmem:[%s1578_s8 + $0x18] sm:$0xff]   ;;  %p1302_p4 = scmp.ne.s32.totalorder %s1677_s9, %s1301_s26  ;;  %s1305_s4 = sshll.u32 %s1393_s21, 4  ;;  %s1306_s4 = int_to_ptr.vmem [resolvable:$false] %s1305_s4 }
  0x5f   : > { %v1232_v13 = vld [vmem:[%s1578_s8 + $0x50] sm:$0xff]   ;;  %v1234_v15 = vld [vmem:[%s1578_s8 + $0x58] sm:$0xff]   ;;  %v1235_v16 = vld [vmem:[%s1578_s8 + $0x20] sm:$0xff]   ;;  %s1307_s6 = scalar_lea.vmem %s1306_s4, 8192  ;;  %p1308_p12 = scmp.lt.s32.totalorder %s1677_s9, %s1306_s4 }
  0x60   : > { %1081 = vmatpush3.bf16.msra.mxu0 %v1220_v1  ;;  %1135 = vmatpush3.bf16.msra.mxu1 %v1220_v1  ;;  %v1236_v17 = vld [vmem:[%s1578_s8 + $0x60] sm:$0xff]   ;;  %v1237_v18 = vld [vmem:[%s1578_s8 + $0x28] sm:$0xff]   ;;  %v1239_v20 = vld [vmem:[%s1578_s8 + $0x30] sm:$0xff]   ;;  %p1303_p6 = pnand %p1302_p4, %p1515_p10  ;;  %p1309_p11 = scmp.lt.s32.totalorder %s1307_s6, %s1301_s26 }
  0x61   : > { %1082 = vmatprep.subr.bf16.mxu0 %v1221_v2  ;;  %1128 = vmatprep.subr.bf16.mxu1 %v1221_v2  ;;  %v1238_v19 = vld [vmem:[%s1578_s8 + $0x68] sm:$0xff]   ;;  %v1240_v21 = vld [vmem:[%s1578_s8 + $0x70] sm:$0xff]   ;;  %v1241_v22 = vld [vmem:[%s1578_s8 + $0x38] sm:$0xff]  }
  0x62   : > { %v1242_v23 = vld [vmem:[%s1578_s8 + $0x78] sm:$0xff]   ;;  %v1607_v24 = vld [vmem:[%s1734_s2] ss:$0 sm:$0xff]  ;;  %p1304_p8 = pneg %p1303_p6  ;;  %p1310_p0 = por %p1309_p11, %p1308_p12 }
  0x64   : > { %1083 = vmatpush3.bf16.msra.mxu0 %v1221_v2  ;;  %1136 = vmatpush3.bf16.msra.mxu1 %v1221_v2  ;;  %p1311_p5 = pnand %p1310_p0, %p1304_p8 }
  0x65   : > { %1084 = vmatprep.subr.bf16.mxu0 %v1222_v3  ;;  %1129 = vmatprep.subr.bf16.mxu1 %v1222_v3 }
  0x68   : > { %1085 = vmatpush3.bf16.msra.mxu0 %v1222_v3  ;;  %1137 = vmatpush3.bf16.msra.mxu1 %v1222_v3 }
  0x69   : > { %1086 = vmatprep.subr.bf16.mxu0 %v1223_v6  ;;  %1130 = vmatprep.subr.bf16.mxu1 %v1223_v6 }
  0x6c   : > { %1087 = vmatpush3.bf16.msra.mxu0 %v1223_v6  ;;  %1138 = vmatpush3.bf16.msra.mxu1 %v1223_v6 }
  0x6d   : > { %1088 = vmatprep.subr.bf16.mxu0 %v1224_v7  ;;  %1131 = vmatprep.subr.bf16.mxu1 %v1224_v7 }
  0x70   : > { %1089 = vmatpush3.bf16.msra.mxu0 %v1224_v7  ;;  %1139 = vmatpush3.bf16.msra.mxu1 %v1224_v7 }
  0x71   : > { %1090 = vmatprep.subr.bf16.mxu0 %v1225_v8  ;;  %1132 = vmatprep.subr.bf16.mxu1 %v1225_v8 }
  0x74   : > { %1091 = vmatpush3.bf16.msra.mxu0 %v1225_v8  ;;  %1140 = vmatpush3.bf16.msra.mxu1 %v1225_v8 }
  0x75   : > { %1092 = vmatprep.subr.bf16.mxu0 %v1226_v9  ;;  %1133 = vmatprep.subr.bf16.mxu1 %v1226_v9 }
  0x78   : > { %1093 = vmatpush3.bf16.msra.mxu0 %v1226_v9  ;;  %1141 = vmatpush3.bf16.msra.mxu1 %v1226_v9 }
  0x7b   : > { %1095 = vmatmul.mubr.bf16.vlgmr.msra.gmra.mrb[0].mxu0 %v1229_v10  ;;  %1111 = vmatmul.mubr.bf16.vlgmr.msra.gmra.mrb[0].mxu1 %v1230_v11 }
  0x7c   : > { %1098 = vmatprep.mubr.bf16.mxu0 %v1231_v12  ;;  %1114 = vmatprep.mubr.bf16.mxu1 %v1232_v13 }
  0x83   : > { %1099 = vmatmul.mubr.bf16.gmra.mrb[4].mxu0 %v1233_v14  ;;  %1115 = vmatmul.mubr.bf16.gmra.mrb[4].mxu1 %v1234_v15 }
  0x84   : > { %1102 = vmatprep.mubr.bf16.mxu0 %v1235_v16  ;;  %1118 = vmatprep.mubr.bf16.mxu1 %v1236_v17 }
  0x8b   : > { %1103 = vmatmul.mubr.bf16.gmra.mrb[8].mxu0 %v1237_v18  ;;  %1119 = vmatmul.mubr.bf16.gmra.mrb[8].mxu1 %v1238_v19 }
  0x8c   : > { %1106 = vmatprep.mubr.bf16.mxu0 %v1239_v20  ;;  %1122 = vmatprep.mubr.bf16.mxu1 %v1240_v21 }
  0x93   : > { %1107 = vmatmul.mubr.bf16.gmra.mrb[12].mxu0 %v1241_v22  ;;  %1123 = vmatmul.mubr.bf16.gmra.mrb[12].mxu1 %v1242_v23 }
 0x14e   : > { %v1096_v25 = vpop.f32.mrb[0].mxu0  ;;  %v1112_v26 = vpop.f32.mrb[0].mxu1 }
 0x14f   : > { %v786_v27 = vadd.f32 %v1096_v25, %v1607_v24  ;;  %v802_v28 = vadd.f32 %v1112_v26, %v1607_v24  ;;  %v551_v29 = vpop.f32.mrb[1].mxu0  ;;  %v615_v30 = vpop.f32.mrb[1].mxu1 }
 0x150   : > { %v784_v31 = vadd.f32 %v1607_v24, %v551_v29  ;;  %v800_v32 = vadd.f32 %v1607_v24, %v615_v30  ;;  %v1097_v33 = vpop.f32.mrb[2].mxu0  ;;  %v1113_v34 = vpop.f32.mrb[2].mxu1 }
 0x151   : > { %v818_v35 = vmax.f32 %v786_v27, 0.0  ;;  %v834_v36 = vmax.f32 %v802_v28, 0.0  ;;  %v787_v37 = vadd.f32 %v1097_v33, %v1607_v24  ;;  %v803_v38 = vadd.f32 %v1113_v34, %v1607_v24  ;;  %v554_v39 = vpop.f32.mrb[3].mxu0  ;;  %v618_v40 = vpop.f32.mrb[3].mxu1 }
 0x152   : > { %v816_v41 = vmax.f32 %v784_v31, 0.0  ;;  %v832_v42 = vmax.f32 %v800_v32, 0.0  ;;  %v785_v43 = vadd.f32 %v1607_v24, %v554_v39  ;;  %v801_v44 = vadd.f32 %v1607_v24, %v618_v40 }
 0x153   : > { %850 = vst [vmem:[%s1618_s10 + $0x10] sm:$0xff] %v818_v35  ;;  %866 = vst [vmem:[%s1618_s10 + $0x90] sm:$0xff] %v834_v36  ;;  %v819_v45 = vmax.f32 %v787_v37, 0.0  ;;  %v835_v46 = vmax.f32 %v803_v38, 0.0 }
 0x154   : > { %848 = vst [vmem:[%s1618_s10] sm:$0xff] %v816_v41  ;;  %864 = vst [vmem:[%s1618_s10 + $0x80] sm:$0xff] %v832_v42  ;;  %v817_v47 = vmax.f32 %v785_v43, 0.0  ;;  %v833_v48 = vmax.f32 %v801_v44, 0.0 }
 0x155   : > { %851 = vst [vmem:[%s1618_s10 + $0x18] sm:$0xff] %v819_v45  ;;  %867 = vst [vmem:[%s1618_s10 + $0x98] sm:$0xff] %v835_v46 }
 0x156   : > { %849 = vst [vmem:[%s1618_s10 + $0x8] sm:$0xff] %v817_v47  ;;  %865 = vst [vmem:[%s1618_s10 + $0x88] sm:$0xff] %v833_v48  ;;  %v1100_v49 = vpop.f32.mrb[4].mxu0  ;;  %v1116_v50 = vpop.f32.mrb[4].mxu1 }
 0x157   : > { %v790_v51 = vadd.f32 %v1100_v49, %v1607_v24  ;;  %v806_v52 = vadd.f32 %v1116_v50, %v1607_v24  ;;  %v567_v53 = vpop.f32.mrb[5].mxu0  ;;  %v631_v54 = vpop.f32.mrb[5].mxu1 }
 0x158   : > { %v788_v55 = vadd.f32 %v1607_v24, %v567_v53  ;;  %v804_v56 = vadd.f32 %v1607_v24, %v631_v54  ;;  %v1101_v57 = vpop.f32.mrb[6].mxu0  ;;  %v1117_v58 = vpop.f32.mrb[6].mxu1 }
 0x159   : > { %v822_v59 = vmax.f32 %v790_v51, 0.0  ;;  %v838_v60 = vmax.f32 %v806_v52, 0.0  ;;  %v791_v61 = vadd.f32 %v1101_v57, %v1607_v24  ;;  %v807_v62 = vadd.f32 %v1117_v58, %v1607_v24  ;;  %v570_v63 = vpop.f32.mrb[7].mxu0  ;;  %v634_v0 = vpop.f32.mrb[7].mxu1 }
 0x15a   : > { %v820_v1 = vmax.f32 %v788_v55, 0.0  ;;  %v836_v2 = vmax.f32 %v804_v56, 0.0  ;;  %v789_v3 = vadd.f32 %v1607_v24, %v570_v63  ;;  %v805_v4 = vadd.f32 %v1607_v24, %v634_v0 }
 0x15b   : > { %854 = vst [vmem:[%s1618_s10 + $0x30] sm:$0xff] %v822_v59  ;;  %870 = vst [vmem:[%s1618_s10 + $0xb0] sm:$0xff] %v838_v60  ;;  %v823_v5 = vmax.f32 %v791_v61, 0.0  ;;  %v839_v6 = vmax.f32 %v807_v62, 0.0 }
 0x15c   : > { %852 = vst [vmem:[%s1618_s10 + $0x20] sm:$0xff] %v820_v1  ;;  %868 = vst [vmem:[%s1618_s10 + $0xa0] sm:$0xff] %v836_v2  ;;  %v821_v7 = vmax.f32 %v789_v3, 0.0  ;;  %v837_v8 = vmax.f32 %v805_v4, 0.0 }
 0x15d   : > { %855 = vst [vmem:[%s1618_s10 + $0x38] sm:$0xff] %v823_v5  ;;  %871 = vst [vmem:[%s1618_s10 + $0xb8] sm:$0xff] %v839_v6 }
 0x15e   : > { %853 = vst [vmem:[%s1618_s10 + $0x28] sm:$0xff] %v821_v7  ;;  %869 = vst [vmem:[%s1618_s10 + $0xa8] sm:$0xff] %v837_v8  ;;  %v1104_v9 = vpop.f32.mrb[8].mxu0  ;;  %v1120_v10 = vpop.f32.mrb[8].mxu1 }
 0x15f   : > { %v794_v11 = vadd.f32 %v1104_v9, %v1607_v24  ;;  %v810_v12 = vadd.f32 %v1120_v10, %v1607_v24  ;;  %v583_v13 = vpop.f32.mrb[9].mxu0  ;;  %v647_v14 = vpop.f32.mrb[9].mxu1 }
 0x160   : > { %v792_v15 = vadd.f32 %v1607_v24, %v583_v13  ;;  %v808_v16 = vadd.f32 %v1607_v24, %v647_v14  ;;  %v1105_v17 = vpop.f32.mrb[10].mxu0  ;;  %v1121_v18 = vpop.f32.mrb[10].mxu1 }
 0x161   : > { %v826_v19 = vmax.f32 %v794_v11, 0.0  ;;  %v842_v20 = vmax.f32 %v810_v12, 0.0  ;;  %v795_v21 = vadd.f32 %v1105_v17, %v1607_v24  ;;  %v811_v22 = vadd.f32 %v1121_v18, %v1607_v24  ;;  %v586_v23 = vpop.f32.mrb[11].mxu0  ;;  %v650_v25 = vpop.f32.mrb[11].mxu1 }
 0x162   : > { %v824_v26 = vmax.f32 %v792_v15, 0.0  ;;  %v840_v27 = vmax.f32 %v808_v16, 0.0  ;;  %v793_v28 = vadd.f32 %v1607_v24, %v586_v23  ;;  %v809_v29 = vadd.f32 %v1607_v24, %v650_v25 }
 0x163   : > { %858 = vst [vmem:[%s1618_s10 + $0x50] sm:$0xff] %v826_v19  ;;  %874 = vst [vmem:[%s1618_s10 + $0xd0] sm:$0xff] %v842_v20  ;;  %v827_v30 = vmax.f32 %v795_v21, 0.0  ;;  %v843_v31 = vmax.f32 %v811_v22, 0.0 }
 0x164   : > { %856 = vst [vmem:[%s1618_s10 + $0x40] sm:$0xff] %v824_v26  ;;  %872 = vst [vmem:[%s1618_s10 + $0xc0] sm:$0xff] %v840_v27  ;;  %v825_v32 = vmax.f32 %v793_v28, 0.0  ;;  %v841_v33 = vmax.f32 %v809_v29, 0.0 }
 0x165   : > { %859 = vst [vmem:[%s1618_s10 + $0x58] sm:$0xff] %v827_v30  ;;  %875 = vst [vmem:[%s1618_s10 + $0xd8] sm:$0xff] %v843_v31 }
 0x166   : > { %857 = vst [vmem:[%s1618_s10 + $0x48] sm:$0xff] %v825_v32  ;;  %873 = vst [vmem:[%s1618_s10 + $0xc8] sm:$0xff] %v841_v33  ;;  %v1108_v34 = vpop.f32.mrb[12].mxu0  ;;  %v1124_v35 = vpop.f32.mrb[12].mxu1 }
 0x167   : > { %v798_v36 = vadd.f32 %v1108_v34, %v1607_v24  ;;  %v814_v37 = vadd.f32 %v1124_v35, %v1607_v24  ;;  %v599_v38 = vpop.f32.mrb[13].mxu0  ;;  %v663_v39 = vpop.f32.mrb[13].mxu1 }
 0x168   : > { %v796_v40 = vadd.f32 %v1607_v24, %v599_v38  ;;  %v812_v41 = vadd.f32 %v1607_v24, %v663_v39  ;;  %v1109_v42 = vpop.f32.mrb[14].mxu0  ;;  %v1125_v43 = vpop.f32.mrb[14].mxu1 }
 0x169   : > { %v830_v44 = vmax.f32 %v798_v36, 0.0  ;;  %v846_v45 = vmax.f32 %v814_v37, 0.0  ;;  %v799_v46 = vadd.f32 %v1109_v42, %v1607_v24  ;;  %v815_v47 = vadd.f32 %v1125_v43, %v1607_v24  ;;  %v602_v48 = vpop.f32.mrb[15].mxu0  ;;  %v666_v49 = vpop.f32.mrb[15].mxu1 }
 0x16a   : > { %v828_v50 = vmax.f32 %v796_v40, 0.0  ;;  %v844_v51 = vmax.f32 %v812_v41, 0.0  ;;  %v797_v52 = vadd.f32 %v1607_v24, %v602_v48  ;;  %v813_v53 = vadd.f32 %v1607_v24, %v666_v49 }
 0x16b   : > { %862 = vst [vmem:[%s1618_s10 + $0x70] sm:$0xff] %v830_v44  ;;  %878 = vst [vmem:[%s1618_s10 + $0xf0] sm:$0xff] %v846_v45  ;;  %v831_v54 = vmax.f32 %v799_v46, 0.0  ;;  %v847_v55 = vmax.f32 %v815_v47, 0.0 }
 0x16c   : > { %860 = vst [vmem:[%s1618_s10 + $0x60] sm:$0xff] %v828_v50  ;;  %876 = vst [vmem:[%s1618_s10 + $0xe0] sm:$0xff] %v844_v51  ;;  %v829_v56 = vmax.f32 %v797_v52, 0.0  ;;  %v845_v57 = vmax.f32 %v813_v53, 0.0 }
 0x16d   : > { %863 = vst [vmem:[%s1618_s10 + $0x78] sm:$0xff] %v831_v54  ;;  %879 = vst [vmem:[%s1618_s10 + $0xf8] sm:$0xff] %v847_v55 }
 0x16e   : > { %861 = vst [vmem:[%s1618_s10 + $0x68] sm:$0xff] %v829_v56  ;;  %877 = vst [vmem:[%s1618_s10 + $0xe8] sm:$0xff] %v845_v57 }
 0x16f   : > { %1314 = shalt.err (!%p1311_p5)
}
 0x170   : > { %s1315_s29 = scalar_lea.hbm %s1675_s19, 4096  ;;  %s1319_s20 = scalar_lea.hbm %s1735_s3, 8192 }
 0x171   : > { %p1316_p9 = scmp.ne.s32.totalorder %s1675_s19, %s1315_s29  ;;  %p1320_p3 = scmp.lt.u32.totalorder %s1675_s19, %s1735_s3 }
 0x172   : > { %p1321_p7 = scmp.lt.u32.totalorder %s1319_s20, %s1315_s29  ;;  %p1323_p4 = scmp.lt.u32.totalorder %s1315_s29, %s1675_s19 }
 0x173   : > { %p1317_p1 = pnand %p1316_p9, %p1515_p10 }
 0x174   : > { %p1322_p13 = por %p1321_p7, %p1320_p3 }
 0x175   : > { %p1318_p2 = pneg %p1317_p1 }
 0x176   : > { %p1324_p6 = por %p1323_p4, %p1322_p13 }
 0x178   : > { %p1325_p8 = pnand %p1324_p6, %p1318_p2 }
 0x17a   : > { %1328 = shalt.err (!%p1325_p8)
}
 0x17b   : > { %s1394_s10 = smov 128   ;;  %s1395_s11 = smov 8  }
 0x17c   : > { %1148 = dma.vmem_to_hbm [thread:$0]  (%p1515_p10), %s1677_s9, 4096, %s1675_s19, %s881_s25, %s1394_s10, %s1394_s10, %s1395_s11  }
 0x17d PF: > { %s910_s15 = sand.u32 1, %s1367_s12   ;;  %p1753_p12 = scmp.ne.s32.totalorder %s1743_s23, 0 }
 0x17e   : > { %p1754_p11 = scmp.ge.s32.totalorder %s1387_s17, 2  ;;  %s911_s18 = scalar_lea.sflag [#allocation5], %s910_s15 }
 0x180   : > { %p1159_p0 = pnand %p1754_p11, %p1753_p12 }
 0x182   : > { %1362 = dma.done.wait (!%p1159_p0), %s911_s18, 4096  }
 0x183   : > { %1364 = vsyncadd (!%p1159_p0), %s911_s18, 4294963200  ;;  %s20_s17 = sadd.s32 1, %s1387_s17   ;;  %s1755_s12 = smov %s1371_s13 }
 0x184   : > { %p17_p5 = scmp.ge.s32.totalorder %s20_s17, 4   ;;  %s1756_s13 = smov %s1375_s14 }
 0x185   : > { %s1757_s14 = smov %s1524_s5  ;;  %s1758_s15 = smov %s1383_s16 }
 0x186   : > { %s1759_s16 = smov %s1761_s28  ;;  %19 = sbr.rel (!%p17_p5) target bundleno = 7 (0x7), region = 93 }
 0x18d   :  { %916 = vsyncpa [#allocation4], 1 }
 0x18e   :  { %918 = vsyncpa [#allocation4 + $0x1], 1 }
 0x18f   :  { %919 = vsyncpa [#allocation7], 1 }
 0x190   :  { %920 = vsyncpa [#allocation5], 1 }
 0x191   :  { %922 = vsyncpa [#allocation5 + $0x1], 1 }

</bundles_post_ra>
